<compile_context>
chip_gen: v5e
topology: v5e:2x2
jax: 0.10.0
libtpu: 0.0.40
codegen_flags: <defaults>
</compile_context>

<pallas_src>
import jax
import jax.numpy as jnp
from jax.experimental import pallas as pl
from jax.experimental.pallas import tpu as pltpu


def _pe_broadcast_kernel(pe_ref, out_ref):
    # pe_ref:  (1, F_TILE)       lane-dense slab of the flattened PE table
    # out_ref: (B_TILE, F_TILE)  lane-dense output slab for B_TILE batch rows
    out_ref[...] = jnp.broadcast_to(pe_ref[...], out_ref.shape)


def _choose_tiles(batch, flat, itemsize, vmem_budget_bytes=24 << 20):
    """Pick (b_tile, f_tile) under a double-buffered VMEM budget.

    Working set ~= 2 * (b_tile + 1) * f_tile * itemsize
    (double-buffered output block + double-buffered input slab).
    """
    # Dtype-aware batch tile: fill packed sublanes (8 x 32-bit rows per vreg).
    if itemsize >= 4:
        b_tile = 8
    elif itemsize == 2:
        b_tile = 16
    else:
        b_tile = 32

    if batch <= b_tile:
        b_tile = batch            # equal to full dim -> always a legal block
    else:
        # Small table: grow b_tile (multiple of 8) so each output block is
        # >= ~2 MiB -> long unmasked writeback DMAs, fewer grid steps.
        target_block_bytes = 2 << 20
        while (b_tile < 128
               and b_tile * 2 <= batch
               and b_tile * flat * itemsize < target_block_bytes):
            b_tile *= 2
        if b_tile >= batch:
            b_tile = batch

    # Largest multiple-of-128 flat tile that keeps the working set in budget.
    f_max = vmem_budget_bytes // (2 * (b_tile + 1) * itemsize)
    if flat <= f_max:
        f_tile = flat             # full axis -> no alignment requirement
    else:
        f_tile = max(128, (f_max // 128) * 128)
    return b_tile, f_tile


def learnable_positional_encoding_1d(x, pe_weight):
    """Pallas equivalent of LearnablePositionalEncoding1D.forward.

    x:         (batch, ...)  -- only the leading batch dim is used.
    pe_weight: (max_len, d_model) -- nn.Embedding weight.
    returns:   (batch, max_len, d_model)
    """
    batch = x.shape[0]
    max_len, d_model = pe_weight.shape
    flat = max_len * d_model
    itemsize = jnp.dtype(pe_weight.dtype).itemsize

    # Lane-dense view of the table: (1, max_len * d_model). Contiguous reshape
    # is metadata-only; the reshape back at the end is also free.
    pe_2d = pe_weight.reshape(1, flat)

    b_tile, f_tile = _choose_tiles(batch, flat, itemsize)

    # Double-buffered working set (in + out); set the scoped-VMEM limit to it
    # plus headroom so it compiles identically on v5e/v6e/v7x.
    working_set = 2 * (b_tile * f_tile + f_tile) * itemsize
    vmem_limit = int(min(max(working_set + (2 << 20), 16 << 20), 32 << 20))

    # Flat-table axis OUTER, batch-tile axis INNER: the input block index is
    # constant across the inner loop, so each table tile is read from HBM once.
    grid = (pl.cdiv(flat, f_tile), pl.cdiv(batch, b_tile))

    out_flat = pl.pallas_call(
        _pe_broadcast_kernel,
        out_shape=jax.ShapeDtypeStruct((batch, flat), pe_weight.dtype),
        grid_spec=pltpu.PrefetchScalarGridSpec(
            num_scalar_prefetch=0,
            grid=grid,
            in_specs=[
                pl.BlockSpec((1, f_tile), lambda f, b: (0, f)),
            ],
            out_specs=pl.BlockSpec((b_tile, f_tile), lambda f, b: (b, f)),
        ),
        compiler_params=pltpu.CompilerParams(
            # Every output block is disjoint (pure broadcast, no accumulation),
            # so both axes are safe to shard across v7x's 2 TensorCores; this
            # keeps both cores busy even when batch fits in a single tile.
            dimension_semantics=("parallel", "parallel"),
            vmem_limit_bytes=vmem_limit,
        ),
        cost_estimate=pl.CostEstimate(
            flops=0,
            transcendentals=0,
            bytes_accessed=(batch + 1) * flat * itemsize,
        ),
    )(pe_2d)

    # Free reshape back to the module's output layout.
    return out_flat.reshape(batch, max_len, d_model)


if __name__ == "__main__":
    key = jax.random.PRNGKey(0)
    k_pe, k_x = jax.random.split(key)

    # Small, module-consistent shapes.
    batch, seq, d_model, max_len = 2, 8, 32, 16

    # nn.Embedding default init: N(0, 1) -- deterministic synthetic init here.
    pe_weight = jax.random.normal(k_pe, (max_len, d_model), dtype=jnp.float32)

    # Input x: only x.shape[0] matters for the forward.
    x = jax.random.normal(k_x, (batch, seq, d_model), dtype=jnp.float32)

    out = learnable_positional_encoding_1d(x, pe_weight)
    out = jax.block_until_ready(out)

    # Reference: pe.weight.unsqueeze(0).repeat(batch, 1, 1)
    ref = jnp.broadcast_to(pe_weight[None, :, :], (batch, max_len, d_model))
    assert out.shape == (batch, max_len, d_model)
    assert jnp.array_equal(out, ref)

    print("KERNEL_OK")
</pallas_src>

<mosaic_0001>
module attributes {stable_mosaic.version = 11 : i64} {
  func.func @_pe_broadcast_kernel(%arg0: i32, %arg1: i32, %arg2: memref<1x512xf32, #tpu.memory_space<vmem>>, %arg3: memref<2x512xf32, #tpu.memory_space<vmem>>) attributes {dimension_semantics = [#tpu.dimension_semantics<parallel>, #tpu.dimension_semantics<parallel>], iteration_bounds = array<i64: 1, 1>, scalar_prefetch = 0 : i64, scratch_operands = 0 : i64, tpu.core_type = #tpu.core_type<tc>, window_params = [{transform_indices = @transform_0, window_bounds = array<i64: 1, 512>}, {transform_indices = @transform_1, window_bounds = array<i64: 2, 512>}]} {
    %c0 = arith.constant 0 : index
    %c0_0 = arith.constant 0 : index
    %0 = vector.load %arg2[%c0, %c0_0] : memref<1x512xf32, #tpu.memory_space<vmem>>, vector<1x512xf32>
    %1 = vector.shape_cast %0 : vector<1x512xf32> to vector<1x512xf32>
    %2 = vector.broadcast %1 : vector<1x512xf32> to vector<2x512xf32>
    %c0_1 = arith.constant 0 : index
    %c0_2 = arith.constant 0 : index
    %3 = vector.load %arg3[%c0_1, %c0_2] : memref<2x512xf32, #tpu.memory_space<vmem>>, vector<2x512xf32>
    tpu.vector_store %arg3[%c0_1, %c0_2], %2 {strides = array<i32>} : memref<2x512xf32, #tpu.memory_space<vmem>>, vector<2x512xf32>,
    return
  }
  func.func @transform_0(%arg0: i32, %arg1: i32) -> (i32, i32) {
    %c0_i32 = arith.constant 0 : i32
    %c0_i32_0 = arith.constant 0 : i32
    return %c0_i32, %arg0 : i32, i32
  }
  func.func @transform_1(%arg0: i32, %arg1: i32) -> (i32, i32) {
    %c0_i32 = arith.constant 0 : i32
    return %arg1, %arg0 : i32, i32
  }
}

</mosaic_0001>

<bundles_post_ra>
// kernel: tpu_custom_call.1
= control target key start
LH: loop header
LB: loop body
LE: loop exit
PB: predicated region body
PF: predicated region fallthrough
CT: control target
= control target key end

     0   :  { %6 = vsyncpa [#allocation3], 0  ;;  %s129_s0 = inlined_call_operand.hbm [shape: f32[1,512], index: 0, kind: input, shape index: {}]   ;;  %s130_s1 = inlined_call_operand.hbm [shape: f32[2,512], index: 1, kind: output, shape index: {}]  }
   0x1   :  { %7 = vsyncpa [#allocation4], 0  ;;  %s13_s8 = sshll.u32 %s129_s0, 4  ;;  %s111_s9 = smov [#allocation2]   ;;  %s14_s8 = int_to_ptr.hbm [resolvable:$true] %s13_s8 }
   0x2   :  { %s15_s10 = sshll.u32 %s111_s9, 4  ;;  %s16_s10 = int_to_ptr.vmem [resolvable:$true] %s15_s10 }
   0x3   :  { %18 = dma.hbm_to_vmem [thread:$0]  %s14_s8, 64, %s16_s10, [#allocation3]  }
   0x4   :  { %107 = dma.done.wait [#allocation3], 64  }
   0x5   :  { %108 = vsyncadd [#allocation3], 4294967232  ;;  %v23_v0 = vld [vmem:[#allocation2] sm:$0xf]  ;;  %vm32_vm0 = vcmask 1041408   ;;  %vm34_vm1 = vcmask 1045508  }
   0x6   :  { %v25_v1 = vperm.slane %v23_v0, 0  ;;  %v26_v2 = vperm.slane %v23_v0, 1  ;;  %v27_v3 = vperm.slane %v23_v0, 2  ;;  %v28_v4 = vperm.slane %v23_v0, 3  ;;  %s112_s11 = smov [#allocation5]   ;;  %s47_s0 = sshll.u32 %s130_s1, 4  ;;  %s48_s0 = int_to_ptr.hbm [resolvable:$true] %s47_s0 }
   0x7   :  { %s45_s12 = sshll.u32 %s112_s11, 4  ;;  %vm36_vm2 = vcmask 1043456   ;;  %s46_s12 = int_to_ptr.vmem [resolvable:$true] %s45_s12 }
   0x8   :  { %v29_v5 = vrot.slane %v26_v2, 6  ;;  %v30_v6 = vrot.slane %v27_v3, 4  ;;  %v31_v7 = vrot.slane %v28_v4, 2 }
   0xa   :  { %v33_v8 = vsel %vm32_vm0, %v25_v1, %v29_v5  ;;  %v35_v9 = vsel %vm34_vm1, %v30_v6, %v31_v7 }
   0xb   :  { %v37_v10 = vsel %vm36_vm2, %v33_v8, %v35_v9 }
   0xc   :  { %39 = vst [vmem:[#allocation5] sm:$0xff] %v37_v10 }
   0xd   :  { %50 = dma.vmem_to_hbm [thread:$0]  %s46_s12, 128, %s48_s0, [#allocation4]  }
   0xe   :  { %109 = dma.done.wait [#allocation4], 128  }
   0xf   :  { %110 = vsyncadd [#allocation4], 4294967168 }
  0x10   :  { %55 = vsyncpa [#allocation3], 1 }
  0x11   :  { %56 = vsyncpa [#allocation4], 1 }

</bundles_post_ra>
